<compile_context>
chip_gen: v7x
topology: tpu7x:2x2x1
jax: 0.10.0
libtpu: 0.0.40
codegen_flags: <defaults>
</compile_context>

<pallas_src>
import jax
import jax.numpy as jnp
from jax.experimental import pallas as pl
from jax.experimental.pallas import tpu as pltpu


def _disc_kernel(x_ref, w1_ref, b1_ref, w2_ref, b2_ref, w3_ref, b3_ref, o_ref, acc_ref):
    k = pl.program_id(1)

    @pl.when(k == 0)
    def _():
        acc_ref[...] = jnp.zeros_like(acc_ref)

    # Layer 1 partial product: (TB, TK) @ (TK, 512), accumulated in f32.
    acc_ref[...] += jnp.dot(x_ref[...], w1_ref[...], preferred_element_type=jnp.float32)

    @pl.when(k == pl.num_programs(1) - 1)
    def _():
        # Epilogue: bias + LeakyReLU, layer 2 on MXU, layer 3 on VPU/XLU.
        h1 = acc_ref[...] + b1_ref[...]                     # (TB, 512) f32
        h1 = jnp.where(h1 > 0, h1, 0.2 * h1)                # LeakyReLU(0.2)

        h2 = jnp.dot(h1.astype(jnp.bfloat16), w2_ref[...],
                     preferred_element_type=jnp.float32) + b2_ref[...]
        h2 = jnp.where(h2 > 0, h2, 0.2 * h2)                # (TB, 256) f32

        # Layer 3 (out_features == 1): VPU mul + XLU row-reduce (MXU N=1 would
        # waste 255/256 output columns).
        w3_row = w3_ref[...].astype(jnp.float32)            # (1, 256)
        out = jnp.sum(h2 * w3_row, axis=-1, keepdims=True) + b3_ref[...]   # (TB, 1)

        # Lane-dense store; column 0 carries the result, sliced in the wrapper.
        o_ref[...] = jnp.broadcast_to(out, o_ref.shape).astype(o_ref.dtype)


def _tpu_flavor():
    """Best-effort TPU generation detection; safe fallback if unavailable."""
    try:
        kind = jax.devices()[0].device_kind.lower()
    except Exception:
        return "unknown"
    if "v5" in kind or "v6" in kind:
        return "v5v6"          # 128 MiB physical VMEM, 1 TC/chip
    if "7" in kind:
        return "v7"            # 64 MiB physical VMEM, 2 TC/chip
    return "unknown"


def _choose_tk(D):
    """Largest power-of-two K tile (<=2048) dividing D with >=3 steps; fall
    back to any exact divisor, then to padded tk=256."""
    cands = (2048, 1024, 512, 256, 128)
    for tk in cands:
        if D % tk == 0 and D // tk >= 3:
            return tk, D
    for tk in cands:
        if D % tk == 0:
            return tk, D
    tk = 256
    return tk, pl.cdiv(D, tk) * tk


def _batch_tiling(B, tb_max, two_tiles):
    b_pad = max(16, pl.cdiv(B, 16) * 16)                    # bf16 sublane packing
    if b_pad > tb_max:
        tb = tb_max
        b_pad = pl.cdiv(b_pad, tb) * tb
    elif two_tiles and b_pad >= 32:
        # v7x megacore: guarantee the "parallel" batch axis has 2 tiles.
        b_pad = pl.cdiv(b_pad, 32) * 32
        tb = b_pad // 2
    else:
        tb = b_pad
    return b_pad, tb


def discriminator_forward(img, params, *, tb_max=1024):
    """img: (B, C, H, W) float32. params: PyTorch-convention (out, in) weights."""
    B = img.shape[0]
    x = img.reshape(B, -1)                                   # matches img.view(B, -1)
    D = x.shape[1]
    H1 = params["w1"].shape[0]                               # 512
    H2 = params["w2"].shape[0]                               # 256

    flavor = _tpu_flavor()
    vmem_limit = {"v5v6": 64 << 20, "v7": 40 << 20}.get(flavor, 32 << 20)

    tk, d_pad = _choose_tk(D)
    b_pad, tb = _batch_tiling(B, tb_max, two_tiles=(flavor == "v7"))

    # bf16 inputs/weights (halves HBM traffic), f32 accumulation in-kernel.
    # Skip the pad copies entirely when shapes already tile evenly.
    x_bf = x.astype(jnp.bfloat16)
    if b_pad == B and d_pad == D:
        x_p = x_bf
    else:
        x_p = jnp.zeros((b_pad, d_pad), jnp.bfloat16).at[:B, :D].set(x_bf)

    w1_t = params["w1"].T.astype(jnp.bfloat16)               # (D, 512)
    if d_pad == D:
        w1 = w1_t
    else:
        w1 = jnp.zeros((d_pad, H1), jnp.bfloat16).at[:D, :].set(w1_t)

    w2 = params["w2"].T.astype(jnp.bfloat16)                 # (512, 256)
    w3 = params["w3"].astype(jnp.bfloat16)                   # (1, 256) row vector
    b1 = params["b1"].reshape(1, H1).astype(jnp.float32)
    b2 = params["b2"].reshape(1, H2).astype(jnp.float32)
    b3 = params["b3"].reshape(1, 1).astype(jnp.float32)

    nb = b_pad // tb
    nk = d_pad // tk

    out_pad = pl.pallas_call(
        _disc_kernel,
        out_shape=jax.ShapeDtypeStruct((b_pad, 128), jnp.float32),
        grid_spec=pltpu.PrefetchScalarGridSpec(
            num_scalar_prefetch=0,
            grid=(nb, nk),
            in_specs=[
                pl.BlockSpec((tb, tk), lambda b, k: (b, k)),     # x: streamed over K
                pl.BlockSpec((tk, H1), lambda b, k: (k, 0)),     # w1: streamed over K
                pl.BlockSpec((1, H1), lambda b, k: (0, 0)),      # b1: grid-invariant
                pl.BlockSpec((H1, H2), lambda b, k: (0, 0)),     # w2: grid-invariant
                pl.BlockSpec((1, H2), lambda b, k: (0, 0)),      # b2: grid-invariant
                pl.BlockSpec((1, H2), lambda b, k: (0, 0)),      # w3: grid-invariant
                pl.BlockSpec((1, 1), lambda b, k: (0, 0)),       # b3: grid-invariant
            ],
            out_specs=pl.BlockSpec((tb, 128), lambda b, k: (b, 0)),
            scratch_shapes=[pltpu.VMEM((tb, H1), jnp.float32)],  # layer-1 f32 accumulator
        ),
        compiler_params=pltpu.CompilerParams(
            dimension_semantics=("parallel", "arbitrary"),
            vmem_limit_bytes=vmem_limit,
        ),
    )(x_p, w1, b1, w2, b2, w3, b3)

    return out_pad[:B, :1]


def init_params(key, in_features, h1=512, h2=256, out_features=1):
    """Deterministic synthetic init; weight shapes follow nn.Linear (out, in)."""
    ks = jax.random.split(key, 6)
    scale = lambda fan_in: 1.0 / jnp.sqrt(jnp.float32(fan_in))
    return {
        "w1": jax.random.uniform(ks[0], (h1, in_features), jnp.float32, -1, 1) * scale(in_features),
        "b1": jax.random.uniform(ks[1], (h1,), jnp.float32, -1, 1) * scale(in_features),
        "w2": jax.random.uniform(ks[2], (h2, h1), jnp.float32, -1, 1) * scale(h1),
        "b2": jax.random.uniform(ks[3], (h2,), jnp.float32, -1, 1) * scale(h1),
        "w3": jax.random.uniform(ks[4], (out_features, h2), jnp.float32, -1, 1) * scale(h2),
        "b3": jax.random.uniform(ks[5], (out_features,), jnp.float32, -1, 1) * scale(h2),
    }


def reference_forward(img, params):
    """Pure-JAX f32 reference matching the PyTorch forward exactly."""
    x = img.reshape(img.shape[0], -1).astype(jnp.float32)
    h1 = x @ params["w1"].T + params["b1"]
    h1 = jnp.where(h1 > 0, h1, 0.2 * h1)
    h2 = h1 @ params["w2"].T + params["b2"]
    h2 = jnp.where(h2 > 0, h2, 0.2 * h2)
    return h2 @ params["w3"].T + params["b3"]


if __name__ == "__main__":
    # Small, module-consistent shapes: opt.channels=4, opt.img_size=16 -> D = 1024.
    B, C, H, W = 2, 4, 16, 16
    key = jax.random.PRNGKey(0)
    k_img, k_par = jax.random.split(key)

    img = jax.random.normal(k_img, (B, C, H, W), dtype=jnp.float32)
    params = init_params(k_par, in_features=C * H * W)

    validity = discriminator_forward(img, params)
    validity = jax.block_until_ready(validity)

    ref = reference_forward(img, params)
    assert validity.shape == (B, 1), validity.shape
    # bf16 inputs/weights with f32 accumulation -> loosened tolerance vs f32 reference.
    assert jnp.allclose(validity, ref, atol=2e-2, rtol=2e-2), (
        float(jnp.max(jnp.abs(validity - ref))))

    print("KERNEL_OK")
</pallas_src>

<mosaic_0001>
module attributes {stable_mosaic.version = 11 : i64} {
  func.func @_disc_kernel(%arg0: i32, %arg1: i32, %arg2: memref<16x256xbf16, #tpu.memory_space<vmem>>, %arg3: memref<256x512xbf16, #tpu.memory_space<vmem>>, %arg4: memref<1x512xf32, #tpu.memory_space<vmem>>, %arg5: memref<512x256xbf16, #tpu.memory_space<vmem>>, %arg6: memref<1x256xf32, #tpu.memory_space<vmem>>, %arg7: memref<1x256xbf16, #tpu.memory_space<vmem>>, %arg8: memref<1x1xf32, #tpu.memory_space<vmem>>, %arg9: memref<16x128xf32, #tpu.memory_space<vmem>>, %arg10: memref<16x512xf32, #tpu.memory_space<vmem>>) attributes {dimension_semantics = [#tpu.dimension_semantics<parallel>, #tpu.dimension_semantics<arbitrary>], iteration_bounds = array<i64: 1, 4>, scalar_prefetch = 0 : i64, scratch_operands = 1 : i64, tpu.core_type = #tpu.core_type<tc>, window_params = [{transform_indices = @transform_0, window_bounds = array<i64: 16, 256>}, {transform_indices = @transform_1, window_bounds = array<i64: 256, 512>}, {pipeline_mode = #tpu.pipeline_mode<synchronous>, transform_indices = @transform_2, window_bounds = array<i64: 1, 512>}, {pipeline_mode = #tpu.pipeline_mode<synchronous>, transform_indices = @transform_3, window_bounds = array<i64: 512, 256>}, {pipeline_mode = #tpu.pipeline_mode<synchronous>, transform_indices = @transform_4, window_bounds = array<i64: 1, 256>}, {pipeline_mode = #tpu.pipeline_mode<synchronous>, transform_indices = @transform_5, window_bounds = array<i64: 1, 256>}, {pipeline_mode = #tpu.pipeline_mode<synchronous>, transform_indices = @transform_6, window_bounds = array<i64: 1, 1>}, {transform_indices = @transform_7, window_bounds = array<i64: 16, 128>}]} {
    %c0_i32 = arith.constant 0 : i32
    %0 = arith.cmpi eq, %arg1, %c0_i32 : i32
    %1 = arith.extui %0 : i1 to i32
    %c0_i32_0 = arith.constant 0 : i32
    %2 = arith.cmpi ne, %1, %c0_i32_0 : i32
    scf.if %2 {
      %cst_9 = arith.constant 0.000000e+00 : f32
      %12 = vector.broadcast %cst_9 : f32 to vector<16x512xf32>
      %c0_10 = arith.constant 0 : index
      %c0_11 = arith.constant 0 : index
      %13 = vector.load %arg10[%c0_10, %c0_11] : memref<16x512xf32, #tpu.memory_space<vmem>>, vector<16x512xf32>
      tpu.vector_store %arg10[%c0_10, %c0_11], %12 {strides = array<i32>} : memref<16x512xf32, #tpu.memory_space<vmem>>, vector<16x512xf32>,
    } else {
    }
    %c0 = arith.constant 0 : index
    %c0_1 = arith.constant 0 : index
    %3 = vector.load %arg10[%c0, %c0_1] : memref<16x512xf32, #tpu.memory_space<vmem>>, vector<16x512xf32>
    %c0_2 = arith.constant 0 : index
    %c0_3 = arith.constant 0 : index
    %4 = vector.load %arg2[%c0_2, %c0_3] : memref<16x256xbf16, #tpu.memory_space<vmem>>, vector<16x256xbf16>
    %c0_4 = arith.constant 0 : index
    %c0_5 = arith.constant 0 : index
    %5 = vector.load %arg3[%c0_4, %c0_5] : memref<256x512xbf16, #tpu.memory_space<vmem>>, vector<256x512xbf16>
    %cst = arith.constant dense<0.000000e+00> : vector<16x512xf32>
    %6 = tpu.matmul %4, %5, %cst {dimension_numbers = #tpu.dot_dimension_numbers<[1], [0], [0], [1], [0, 0, 1, 1], [], []>} : vector<16x256xbf16>, vector<256x512xbf16>, vector<16x512xf32> -> vector<16x512xf32>
    %7 = arith.addf %3, %6 : vector<16x512xf32>
    %c0_6 = arith.constant 0 : index
    %c0_7 = arith.constant 0 : index
    %8 = vector.load %arg10[%c0_6, %c0_7] : memref<16x512xf32, #tpu.memory_space<vmem>>, vector<16x512xf32>
    tpu.vector_store %arg10[%c0_6, %c0_7], %7 {strides = array<i32>} : memref<16x512xf32, #tpu.memory_space<vmem>>, vector<16x512xf32>,
    %c3_i32 = arith.constant 3 : i32
    %9 = arith.cmpi eq, %arg1, %c3_i32 : i32
    %10 = arith.extui %9 : i1 to i32
    %c0_i32_8 = arith.constant 0 : i32
    %11 = arith.cmpi ne, %10, %c0_i32_8 : i32
    scf.if %11 {
      %c0_9 = arith.constant 0 : index
      %c0_10 = arith.constant 0 : index
      %12 = vector.load %arg10[%c0_9, %c0_10] : memref<16x512xf32, #tpu.memory_space<vmem>>, vector<16x512xf32>
      %c0_11 = arith.constant 0 : index
      %c0_12 = arith.constant 0 : index
      %13 = vector.load %arg4[%c0_11, %c0_12] : memref<1x512xf32, #tpu.memory_space<vmem>>, vector<1x512xf32>
      %14 = vector.broadcast %13 : vector<1x512xf32> to vector<16x512xf32>
      %15 = arith.addf %12, %14 : vector<16x512xf32>
      %cst_13 = arith.constant 0.000000e+00 : f32
      %16 = vector.broadcast %cst_13 : f32 to vector<16x512xf32>
      %17 = arith.cmpf ogt, %15, %16 : vector<16x512xf32>
      %cst_14 = arith.constant 2.000000e-01 : f32
      %18 = vector.broadcast %cst_14 : f32 to vector<16x512xf32>
      %19 = arith.mulf %18, %15 : vector<16x512xf32>
      %20 = arith.select %17, %15, %19 : vector<16x512xi1>, vector<16x512xf32>
      %21 = arith.truncf %20 : vector<16x512xf32> to vector<16x512xbf16>
      %c0_15 = arith.constant 0 : index
      %c0_16 = arith.constant 0 : index
      %22 = vector.load %arg5[%c0_15, %c0_16] : memref<512x256xbf16, #tpu.memory_space<vmem>>, vector<512x256xbf16>
      %cst_17 = arith.constant dense<0.000000e+00> : vector<16x256xf32>
      %23 = tpu.matmul %21, %22, %cst_17 {dimension_numbers = #tpu.dot_dimension_numbers<[1], [0], [0], [1], [0, 0, 1, 1], [], []>} : vector<16x512xbf16>, vector<512x256xbf16>, vector<16x256xf32> -> vector<16x256xf32>
      %c0_18 = arith.constant 0 : index
      %c0_19 = arith.constant 0 : index
      %24 = vector.load %arg6[%c0_18, %c0_19] : memref<1x256xf32, #tpu.memory_space<vmem>>, vector<1x256xf32>
      %25 = vector.broadcast %24 : vector<1x256xf32> to vector<16x256xf32>
      %26 = arith.addf %23, %25 : vector<16x256xf32>
      %cst_20 = arith.constant 0.000000e+00 : f32
      %27 = vector.broadcast %cst_20 : f32 to vector<16x256xf32>
      %28 = arith.cmpf ogt, %26, %27 : vector<16x256xf32>
      %cst_21 = arith.constant 2.000000e-01 : f32
      %29 = vector.broadcast %cst_21 : f32 to vector<16x256xf32>
      %30 = arith.mulf %29, %26 : vector<16x256xf32>
      %31 = arith.select %28, %26, %30 : vector<16x256xi1>, vector<16x256xf32>
      %c0_22 = arith.constant 0 : index
      %c0_23 = arith.constant 0 : index
      %32 = vector.load %arg7[%c0_22, %c0_23] : memref<1x256xbf16, #tpu.memory_space<vmem>>, vector<1x256xbf16>
      %33 = arith.extf %32 : vector<1x256xbf16> to vector<1x256xf32>
      %34 = vector.broadcast %33 : vector<1x256xf32> to vector<16x256xf32>
      %35 = arith.mulf %31, %34 : vector<16x256xf32>
      %cst_24 = arith.constant dense<0.000000e+00> : vector<16xf32>
      %36 = vector.multi_reduction <add>, %35, %cst_24 [1] : vector<16x256xf32> to vector<16xf32>
      %37 = vector.shape_cast %36 : vector<16xf32> to vector<16x1xf32>
      %c0_25 = arith.constant 0 : index
      %c0_26 = arith.constant 0 : index
      %38 = vector.load %arg8[%c0_25, %c0_26] : memref<1x1xf32, #tpu.memory_space<vmem>>, vector<1x1xf32>
      %39 = vector.broadcast %38 : vector<1x1xf32> to vector<16x1xf32>
      %40 = arith.addf %37, %39 : vector<16x1xf32>
      %41 = vector.shape_cast %40 : vector<16x1xf32> to vector<16x1xf32>
      %42 = vector.broadcast %41 : vector<16x1xf32> to vector<16x128xf32>
      %c0_27 = arith.constant 0 : index
      %c0_28 = arith.constant 0 : index
      %43 = vector.load %arg9[%c0_27, %c0_28] : memref<16x128xf32, #tpu.memory_space<vmem>>, vector<16x128xf32>
      tpu.vector_store %arg9[%c0_27, %c0_28], %42 {strides = array<i32>} : memref<16x128xf32, #tpu.memory_space<vmem>>, vector<16x128xf32>,
    } else {
    }
    return
  }
  func.func @transform_0(%arg0: i32, %arg1: i32) -> (i32, i32) {
    %c0_i32 = arith.constant 0 : i32
    return %arg0, %arg1 : i32, i32
  }
  func.func @transform_1(%arg0: i32, %arg1: i32) -> (i32, i32) {
    %c0_i32 = arith.constant 0 : i32
    %c0_i32_0 = arith.constant 0 : i32
    return %arg1, %c0_i32 : i32, i32
  }
  func.func @transform_2(%arg0: i32, %arg1: i32) -> (i32, i32) {
    %c0_i32 = arith.constant 0 : i32
    %c0_i32_0 = arith.constant 0 : i32
    %c0_i32_1 = arith.constant 0 : i32
    return %c0_i32, %c0_i32_0 : i32, i32
  }
  func.func @transform_3(%arg0: i32, %arg1: i32) -> (i32, i32) {
    %c0_i32 = arith.constant 0 : i32
    %c0_i32_0 = arith.constant 0 : i32
    %c0_i32_1 = arith.constant 0 : i32
    return %c0_i32, %c0_i32_0 : i32, i32
  }
  func.func @transform_4(%arg0: i32, %arg1: i32) -> (i32, i32) {
    %c0_i32 = arith.constant 0 : i32
    %c0_i32_0 = arith.constant 0 : i32
    %c0_i32_1 = arith.constant 0 : i32
    return %c0_i32, %c0_i32_0 : i32, i32
  }
  func.func @transform_5(%arg0: i32, %arg1: i32) -> (i32, i32) {
    %c0_i32 = arith.constant 0 : i32
    %c0_i32_0 = arith.constant 0 : i32
    %c0_i32_1 = arith.constant 0 : i32
    return %c0_i32, %c0_i32_0 : i32, i32
  }
  func.func @transform_6(%arg0: i32, %arg1: i32) -> (i32, i32) {
    %c0_i32 = arith.constant 0 : i32
    %c0_i32_0 = arith.constant 0 : i32
    %c0_i32_1 = arith.constant 0 : i32
    return %c0_i32, %c0_i32_0 : i32, i32
  }
  func.func @transform_7(%arg0: i32, %arg1: i32) -> (i32, i32) {
    %c0_i32 = arith.constant 0 : i32
    %c0_i32_0 = arith.constant 0 : i32
    return %arg0, %c0_i32 : i32, i32
  }
}

</mosaic_0001>

<bundles_post_ra>
// kernel: tpu_custom_call.1
= control target key start
LH: loop header
LB: loop body
LE: loop exit
PB: predicated region body
PF: predicated region fallthrough
CT: control target
= control target key end

     0   :  { %s2621_s0 = inlined_call_operand.hbm [shape: bf16[16,1024], index: 0, kind: input, shape index: {}]   ;;  %s2622_s1 = inlined_call_operand.hbm [shape: bf16[1024,512], index: 1, kind: input, shape index: {}]   ;;  %s2623_s2 = inlined_call_operand.vmem [shape: f32[1,512], index: 2, kind: input, shape index: {}]   ;;  %s2624_s3 = inlined_call_operand.hbm [shape: bf16[512,256], index: 3, kind: input, shape index: {}]   ;;  %s2625_s4 = inlined_call_operand.vmem [shape: f32[1,256], index: 4, kind: input, shape index: {}]   ;;  %s2626_s5 = inlined_call_operand.vmem [shape: bf16[1,256], index: 5, kind: input, shape index: {}]   ;;  %s2627_s6 = inlined_call_operand.<no memory space> [shape: f32[1,1], index: 6, kind: input, shape index: {}]   ;;  %s2628_s7 = inlined_call_operand.hbm [shape: f32[16,128], index: 7, kind: output, shape index: {}]  }
   0x1   :  { %2636 = sst [smem:[#allocation17_spill]] %s2621_s0  ;;  %v12_v0 = vstv %s2627_s6 }
   0x2   :  { %2637 = sst [smem:[#allocation18_spill]] %s2624_s3  ;;  %13 = vst [vmem:[#allocation3] sm:$0x1] %v12_v0 }
   0x3   :  { %14 = vsyncpa [#allocation5], 0 }
   0x4   :  { %16 = vsyncpa [#allocation5 + $0x1], 0 }
   0x5   :  { %17 = vsyncpa [#allocation8], 0 }
   0x6   :  { %19 = vsyncpa [#allocation8 + $0x1], 0 }
   0x7   :  { %20 = vsyncpa [#allocation6], 0  ;;  %s2291_s26 = smov 0   ;;  %s2293_s27 = smov 0  }
   0x8   :  { %s2295_s28 = smov 0   ;;  %s2297_s29 = smov 0  }
   0x9   :  { %s2299_s30 = smov 0   ;;  %s2301_s8 = smov 0  }
   0xa LB: > { %s2320_s6 = sadd.s32 4294967295, %s2233_s8   ;;  %s47_s9 = sadd.s32 1, %s2221_s28  ;;  %s2233_s8 = sphi %s2301_s8, %s26_s8   ;;  %s2229_s30 = sphi %s2299_s30, %s2660_s30   ;;  %s2225_s29 = sphi %s2297_s29, %s2659_s29   ;;  %s2221_s28 = sphi %s2295_s28, %s2658_s28   ;;  %s2217_s27 = sphi %s2293_s27, %s2657_s27   ;;  %s2213_s26 = sphi %s2291_s26, %s2656_s26  }
   0xb   : > { %p54_p0 = scmp.ne.s32.totalorder %s2221_s28, %s2217_s27  ;;  %p55_p1 = scmp.eq.s32.totalorder %s2233_s8, 0 }
   0xc   : > { %p60_p2 = scmp.ne.s32.totalorder %s2217_s27, %s2213_s26  ;;  %p2629_p3 = scmp.eq.s32.totalorder %s2320_s6, 0 }
   0xd   : > { %p56_p4 = por %p55_p1, %p54_p0  ;;  %p1611_p5 = scmp.ge.s32.totalorder %s2233_s8, 1 }
   0xe   : > { %p2331_p6 = por %p2629_p3, %p60_p2  ;;  %p228_p7 = scmp.lt.s32.totalorder %s2233_s8, 5 }
   0xf   : > { %s2235_s12 = smov [#allocation9]   ;;  %p1797_p10 = scmp.lt.s32.totalorder %s2233_s8, 4 }
  0x10   : > { %s2638_s10 = scalar_select %p2331_p6, 1, 0 }
  0x11   : > { %p2336_p8 = pnand %p1611_p5, %p228_p7  ;;  %s243_s13 = sshll.u32 %s2235_s12, 4  ;;  %s244_s13 = int_to_ptr.vmem [resolvable:$true] %s243_s13 }
  0x12   : > { %p2349_p12 = pnand %p1797_p10, %p56_p4  ;;  %s35_s16 = sadd.s32 1, %s2229_s30 }
  0x13   : > { %s2639_s11 = scalar_select %p2336_p8, 1, 0 }
  0x14   : > { %p1785_p9 = pneg %p2336_p8  ;;  %s2642_s3 = sld [smem:[#allocation18_spill]] }
  0x15   : > { %s2641_s15 = scalar_select %p2349_p12, 1, 0 }
  0x16   : > { %p2345_p11 = pnand %p1785_p9, %p2629_p3 }
  0x18   : > { %p2059_p0 = pneg %p2345_p11 }
  0x1a   : > { %s2057_s19 = scalar_lea.hbm %s2642_s3, 8192 }
  0x1b   : > { %p2058_p13 = scmp.ne.s32.totalorder %s2642_s3, %s2057_s19  ;;  %p2064_p4 = scmp.lt.u32.totalorder %s2057_s19, %s2642_s3 }
  0x1d   : > { %p2060_p1 = pnand %p2059_p0, %p2058_p13 }
  0x1f   : > { %p2061_p2 = pneg %p2060_p1 }
  0x21   : > { %p2066_p5 = pnand %p2064_p4, %p2061_p2 }
  0x23   : > { %2069 = shalt.err (!%p2066_p5)
}
  0x24   : > { %s2070_s24 = scalar_lea.vmem %s244_s13, 8192  ;;  %p2078_p3 = scmp.lt.s32.totalorder %s244_s13, %s244_s13 }
  0x25   : > { %p2071_p7 = scmp.ne.s32.totalorder %s244_s13, %s2070_s24  ;;  %p2079_p6 = scmp.lt.s32.totalorder %s2070_s24, %s2070_s24 }
  0x27   : > { %p2073_p9 = pnand %p2071_p7, %p2059_p0  ;;  %p2080_p8 = por %p2079_p6, %p2078_p3 }
  0x29   : > { %p2074_p10 = pneg %p2073_p9 }
  0x2b   : > { %p2081_p12 = pnand %p2080_p8, %p2074_p10 }
  0x2d   : > { %2084 = shalt.err (!%p2081_p12)
}
  0x2e   : > { %s2633_s25 = smov 128   ;;  %s2634_s26 = smov 8  }
  0x2f   : > { %1788 = dma.hbm_to_vmem [thread:$0]  (!%p2345_p11), %s2642_s3, 8192, %s244_s13, [#allocation8], %s2633_s25, %s2633_s25, %s2634_s26  }
  0x30   : > { %p36_p3 = scmp.ge.s32.totalorder %s35_s16, 4  ;;  %s2374_s18 = sand.u32 1, %s2221_s28  }
  0x31   : > { %s1762_s19 = sshll.u32 %s2229_s30, 7  ;;  %s1614_s20 = sshll.u32 %s2374_s18, 4 }
  0x32   : > { %s2662_s16 = smov (%p36_p3, %s35_s16), 0  ;;  %s2644_s0 = sld [smem:[#allocation17_spill]] }
  0x33   : > { %2643 = sst [smem:[#allocation15_spill]] %s2662_s16  ;;  %s43_s14 = ssub.s32 %s2229_s30, %s2662_s16 }
  0x34   : > { %p45_p6 = scmp.eq.s32.totalorder %s43_s14, 0  ;;  %s270_s13 = scalar_lea.vmem [#allocation4], %s1614_s20 }
  0x35   : > { %s280_s24 = sshll.u32 %s270_s13, 4  ;;  %s267_s25 = scalar_lea.sflag [#allocation5], %s2374_s18  ;;  %s2392_s24 = int_to_ptr.vmem [resolvable:$true] %s280_s24 }
  0x36   : > { %s2390_s12 = scalar_select %p45_p6, %s2221_s28, %s47_s9  }
  0x37   : > { %p2646_p11 = scmp.ne.s32.totalorder %s2641_s15, 0 }
  0x38   : > { %s2385_s23 = scalar_lea.hbm %s2644_s0, %s1762_s19  ;;  %2645 = sst [smem:[#allocation16_spill]] %s2390_s12 }
  0x39   : > { %s2085_s26 = scalar_lea.hbm %s2385_s23, 256  ;;  %p2087_p12 = pneg %p2646_p11 }
  0x3a   : > { %p2086_p8 = scmp.ne.s32.totalorder %s2385_s23, %s2085_s26  ;;  %s2090_s20 = scalar_lea.hbm %s2644_s0, 1024 }
  0x3b   : > { %p2091_p1 = scmp.lt.u32.totalorder %s2385_s23, %s2644_s0  ;;  %p2092_p2 = scmp.lt.u32.totalorder %s2090_s20, %s2085_s26 }
  0x3c   : > { %p2088_p13 = pnand %p2087_p12, %p2086_p8  ;;  %p2094_p5 = scmp.lt.u32.totalorder %s2085_s26, %s2385_s23 }
  0x3d   : > { %p2093_p4 = por %p2092_p2, %p2091_p1 }
  0x3e   : > { %p2089_p0 = pneg %p2088_p13 }
  0x3f   : > { %p2095_p7 = por %p2094_p5, %p2093_p4 }
  0x41   : > { %p2096_p9 = pnand %p2095_p7, %p2089_p0 }
  0x43   : > { %2099 = shalt.err (!%p2096_p9)
}
  0x44   : > { %s2100_s9 = scalar_lea.vmem %s2392_s24, 256  ;;  %s2238_s13 = smov [#allocation4]  }
  0x45   : > { %p2101_p10 = scmp.ne.s32.totalorder %s2392_s24, %s2100_s9  ;;  %s2105_s19 = sshll.u32 %s2238_s13, 4  ;;  %s2106_s19 = int_to_ptr.vmem [resolvable:$false] %s2105_s19 }
  0x46   : > { %s2107_s14 = scalar_lea.vmem %s2106_s19, 512  ;;  %p2108_p8 = scmp.lt.s32.totalorder %s2392_s24, %s2106_s19 }
  0x47   : > { %p2103_p3 = pnand %p2101_p10, %p2087_p12  ;;  %p2109_p13 = scmp.lt.s32.totalorder %s2107_s14, %s2100_s9 }
  0x49   : > { %p2104_p6 = pneg %p2103_p3  ;;  %p2110_p1 = por %p2109_p13, %p2108_p8 }
  0x4b   : > { %p2111_p2 = pnand %p2110_p1, %p2104_p6 }
  0x4d   : > { %2114 = shalt.err (!%p2111_p2)
}
  0x4e   : > { %s2239_s26 = smov 512   ;;  %s2647_s20 = smov 8  }
  0x4f   : > { %s2648_s21 = smov 128   ;;  %s1617_s22 = sshll.u32 %s2374_s18, 9 }
  0x50   : > { %1792 = dma.hbm_to_vmem [thread:$0]  (!%p2646_p11), %s2385_s23, 256, %s2392_s24, %s267_s25, %s2239_s26, %s2648_s21, %s2647_s20  }
  0x51   : > { %s1764_s13 = sshll.u32 %s2229_s30, 13  ;;  %s294_s17 = scalar_lea.vmem [#allocation7], %s1617_s22 }
  0x52   : > { %s2430_s14 = scalar_lea.hbm %s2622_s1, %s1764_s13  ;;  %s302_s0 = sshll.u32 %s294_s17, 4  ;;  %s2432_s0 = int_to_ptr.vmem [resolvable:$true] %s302_s0 }
  0x53   : > { %s2649_s3 = sand.u32 1, %s2233_s8   ;;  %s2115_s12 = scalar_lea.hbm %s2430_s14, 8192 }
  0x54   : > { %s2436_s16 = scalar_lea.sflag [#allocation8], %s2649_s3  ;;  %p2116_p0 = scmp.ne.s32.totalorder %s2430_s14, %s2115_s12 }
  0x55   : > { %s2120_s23 = scalar_lea.hbm %s2622_s1, 32768  ;;  %p2121_p7 = scmp.lt.u32.totalorder %s2430_s14, %s2622_s1 }
  0x56   : > { %p2118_p4 = pnand %p2116_p0, %p2087_p12  ;;  %p2122_p9 = scmp.lt.u32.totalorder %s2120_s23, %s2115_s12 }
  0x57   : > { %p2124_p3 = scmp.lt.u32.totalorder %s2115_s12, %s2430_s14 }
  0x58   : > { %p2119_p5 = pneg %p2118_p4  ;;  %p2123_p10 = por %p2122_p9, %p2121_p7 }
  0x5a   : > { %p2125_p6 = por %p2124_p3, %p2123_p10 }
  0x5c   : > { %p2126_p8 = pnand %p2125_p6, %p2119_p5 }
  0x5e   : > { %2129 = shalt.err (!%p2126_p8)
}
  0x5f   : > { %s2130_s3 = scalar_lea.vmem %s2432_s0, 8192  ;;  %s2240_s17 = smov [#allocation7]  }
  0x60   : > { %p2131_p13 = scmp.ne.s32.totalorder %s2432_s0, %s2130_s3  ;;  %s2135_s20 = sshll.u32 %s2240_s17, 4  ;;  %s2136_s20 = int_to_ptr.vmem [resolvable:$false] %s2135_s20 }
  0x61   : > { %s2137_s21 = scalar_lea.vmem %s2136_s20, 16384  ;;  %p2138_p0 = scmp.lt.s32.totalorder %s2432_s0, %s2136_s20 }
  0x62   : > { %p2133_p1 = pnand %p2131_p13, %p2087_p12  ;;  %p2139_p4 = scmp.lt.s32.totalorder %s2137_s21, %s2130_s3 }
  0x64   : > { %p2134_p2 = pneg %p2133_p1  ;;  %p2140_p7 = por %p2139_p4, %p2138_p0 }
  0x66   : > { %p2141_p9 = pnand %p2140_p7, %p2134_p2 }
  0x68   : > { %2144 = shalt.err (!%p2141_p9)
}
  0x69   : > { %s2241_s12 = smov 256   ;;  %s2242_s22 = smov 16  }
  0x6a   : > { %1795 = dma.hbm_to_vmem [thread:$0]  (!%p2646_p11), %s2430_s14, 8192, %s2432_s0, %s2436_s16, %s2241_s12, %s2241_s12, %s2242_s22  }
  0x6b   : > { %p2650_p12 = scmp.ne.s32.totalorder %s2639_s11, 0 }
  0x6c   : > { %s316_s13 = sand.u32 (!%p2650_p12), 1, %s2217_s27   ;;  %p2651_p5 = scmp.ne.s32.totalorder (!%p2650_p12), %s2638_s10, 0 }
  0x6d   : > { %314 = sbr.rel (%p2650_p12) target bundleno = 962 (0x3c2), region = 48  ;;  %s1622_s9 = sshll.u32 (!%p2650_p12), %s316_s13, 4 }
  0x6e   : > { %s317_s19 = scalar_lea.sflag (!%p2650_p12), [#allocation5], %s316_s13  ;;  %s2465_s25 = scalar_lea.vmem (!%p2650_p12), [#allocation4], %s1622_s9 }
  0x74   : > { %2196 = dma.done.wait (%p2651_p5), %s317_s19, 256  }
  0x75   : > { %2198 = vsyncadd (%p2651_p5), %s317_s19, 4294967040  ;;  %s325_s18 = sand.u32 1, %s2320_s6   ;;  %s1623_s15 = sshll.u32 %s316_s13, 9 }
  0x76   : > { %s326_s0 = scalar_lea.sflag [#allocation8], %s325_s18  ;;  %s2472_s16 = scalar_lea.vmem [#allocation7], %s1623_s15 }
  0x77   : > { %2200 = dma.done.wait (%p2651_p5), %s326_s0, 8192  }
  0x78   : > { %2202 = vsyncadd (%p2651_p5), %s326_s0, 4294959104  ;;  %p2652_p11 = scmp.eq.s32.totalorder %s2320_s6, 0 }
  0x7a   : > { %2204 = dma.done.wait (%p2652_p11), [#allocation8], 8192   ;;  %p2653_p10 = pmov %p2652_p11 }
  0x7b   : > { %p1625_p3 = scmp.ne.s32.totalorder %s2225_s29, 0 }
  0x7c   : > { %2206 = vsyncadd (%p2653_p10), [#allocation8], 4294959104  ;;  %v2243_v1 = vmov (!%p1625_p3), 0.0  }
  0x7d   : > { %371 = sbr.rel (%p1625_p3) target bundleno = 132 (0x84), region = 64  ;;  %372 = vst [vmem:[#allocation2] sm:$0xff] (!%p1625_p3), %v2243_v1  ;;  %373 = vst [vmem:[#allocation2 + $0x8] sm:$0xff] (!%p1625_p3), %v2243_v1 }
  0x7e   : > { %374 = vst [vmem:[#allocation2 + $0x10] sm:$0xff] (!%p1625_p3), %v2243_v1  ;;  %375 = vst [vmem:[#allocation2 + $0x18] sm:$0xff] (!%p1625_p3), %v2243_v1 }
  0x7f   : > { %376 = vst [vmem:[#allocation2 + $0x20] sm:$0xff] (!%p1625_p3), %v2243_v1  ;;  %377 = vst [vmem:[#allocation2 + $0x28] sm:$0xff] (!%p1625_p3), %v2243_v1 }
  0x80   : > { %378 = vst [vmem:[#allocation2 + $0x30] sm:$0xff] (!%p1625_p3), %v2243_v1  ;;  %379 = vst [vmem:[#allocation2 + $0x38] sm:$0xff] (!%p1625_p3), %v2243_v1 }
  0x84 PF: > { %v1860_v2 = vld [vmem:[%s2472_s16 + $0x4] ss:$16 sps:$4 sm:$0xff]   ;;  %v1862_v3 = vld [vmem:[%s2472_s16 + $0xc] ss:$16 sps:$4 sm:$0xff]   ;;  %v1864_v4 = vld [vmem:[%s2472_s16] ss:$16 sps:$4 sm:$0xff]  }
  0x85   : > { %784 = vmatprep.subr.bf16.mxu0 %v1860_v2  ;;  %v1865_v5 = vld [vmem:[%s2472_s16 + $0x8] ss:$16 sps:$4 sm:$0xff]   ;;  %827 = vmatprep.subr.bf16.mxu1 %v1862_v3  ;;  %v1866_v6 = vld [vmem:[%s2472_s16 + $0x24] ss:$16 sps:$4 sm:$0xff]   ;;  %v1868_v7 = vld [vmem:[%s2472_s16 + $0x2c] ss:$16 sps:$4 sm:$0xff]  }
  0x86   : > { %785 = vmatpush1.bf16.msra.mxu0 %v1864_v4  ;;  %828 = vmatpush1.bf16.msra.mxu1 %v1865_v5  ;;  %v1870_v8 = vld [vmem:[%s2472_s16 + $0x20] ss:$16 sps:$4 sm:$0xff]   ;;  %v1871_v9 = vld [vmem:[%s2472_s16 + $0x28] ss:$16 sps:$4 sm:$0xff]   ;;  %v1872_v10 = vld [vmem:[%s2472_s16 + $0x44] ss:$16 sps:$4 sm:$0xff]  }
  0x87   : > { %786 = vmatprep.subr.bf16.mxu0 %v1866_v6  ;;  %829 = vmatprep.subr.bf16.mxu1 %v1868_v7  ;;  %v1874_v11 = vld [vmem:[%s2472_s16 + $0x4c] ss:$16 sps:$4 sm:$0xff]   ;;  %v1876_v12 = vld [vmem:[%s2472_s16 + $0x40] ss:$16 sps:$4 sm:$0xff]   ;;  %v1877_v13 = vld [vmem:[%s2472_s16 + $0x48] ss:$16 sps:$4 sm:$0xff]  }
  0x88   : > { %v1878_v14 = vld [vmem:[%s2472_s16 + $0x64] ss:$16 sps:$4 sm:$0xff]   ;;  %v1880_v15 = vld [vmem:[%s2472_s16 + $0x6c] ss:$16 sps:$4 sm:$0xff]   ;;  %v1882_v16 = vld [vmem:[%s2472_s16 + $0x60] ss:$16 sps:$4 sm:$0xff]  }
  0x89   : > { %v1883_v17 = vld [vmem:[%s2472_s16 + $0x68] ss:$16 sps:$4 sm:$0xff]   ;;  %v1884_v18 = vld [vmem:[%s2472_s16 + $0x84] ss:$16 sps:$4 sm:$0xff]   ;;  %v1886_v19 = vld [vmem:[%s2472_s16 + $0x8c] ss:$16 sps:$4 sm:$0xff]  }
  0x8a   : > { %787 = vmatpush1.bf16.msra.mxu0 %v1870_v8  ;;  %830 = vmatpush1.bf16.msra.mxu1 %v1871_v9  ;;  %v1888_v20 = vld [vmem:[%s2472_s16 + $0x80] ss:$16 sps:$4 sm:$0xff]   ;;  %v1889_v21 = vld [vmem:[%s2472_s16 + $0x88] ss:$16 sps:$4 sm:$0xff]   ;;  %v1890_v22 = vld [vmem:[%s2472_s16 + $0xa4] ss:$16 sps:$4 sm:$0xff]  }
  0x8b   : > { %788 = vmatprep.subr.bf16.mxu0 %v1872_v10  ;;  %831 = vmatprep.subr.bf16.mxu1 %v1874_v11  ;;  %v1892_v23 = vld [vmem:[%s2472_s16 + $0xac] ss:$16 sps:$4 sm:$0xff]   ;;  %v1894_v24 = vld [vmem:[%s2472_s16 + $0xa0] ss:$16 sps:$4 sm:$0xff]   ;;  %v1895_v25 = vld [vmem:[%s2472_s16 + $0xa8] ss:$16 sps:$4 sm:$0xff]  }
  0x8c   : > { %v1896_v26 = vld [vmem:[%s2472_s16 + $0xc4] ss:$16 sps:$4 sm:$0xff]   ;;  %v1898_v27 = vld [vmem:[%s2472_s16 + $0xcc] ss:$16 sps:$4 sm:$0xff]   ;;  %v1900_v28 = vld [vmem:[%s2472_s16 + $0xc0] ss:$16 sps:$4 sm:$0xff]  }
  0x8d   : > { %v1901_v29 = vld [vmem:[%s2472_s16 + $0xc8] ss:$16 sps:$4 sm:$0xff]   ;;  %v1902_v30 = vld [vmem:[%s2472_s16 + $0xe4] ss:$16 sps:$4 sm:$0xff]   ;;  %v1904_v31 = vld [vmem:[%s2472_s16 + $0xec] ss:$16 sps:$4 sm:$0xff]  }
  0x8e   : > { %789 = vmatpush1.bf16.msra.mxu0 %v1876_v12  ;;  %832 = vmatpush1.bf16.msra.mxu1 %v1877_v13  ;;  %v1906_v32 = vld [vmem:[%s2472_s16 + $0xe0] ss:$16 sps:$4 sm:$0xff]   ;;  %v1907_v33 = vld [vmem:[%s2472_s16 + $0xe8] ss:$16 sps:$4 sm:$0xff]   ;;  %v1908_v34 = vld [vmem:[%s2472_s16 + $0x104] ss:$16 sps:$4 sm:$0xff]  }
  0x8f   : > { %790 = vmatprep.subr.bf16.mxu0 %v1878_v14  ;;  %833 = vmatprep.subr.bf16.mxu1 %v1880_v15  ;;  %v1910_v35 = vld [vmem:[%s2472_s16 + $0x10c] ss:$16 sps:$4 sm:$0xff]   ;;  %v1912_v36 = vld [vmem:[%s2472_s16 + $0x100] ss:$16 sps:$4 sm:$0xff]   ;;  %v1913_v37 = vld [vmem:[%s2472_s16 + $0x108] ss:$16 sps:$4 sm:$0xff]  }
  0x90   : > { %v1914_v38 = vld [vmem:[%s2472_s16 + $0x124] ss:$16 sps:$4 sm:$0xff]   ;;  %v1916_v39 = vld [vmem:[%s2472_s16 + $0x12c] ss:$16 sps:$4 sm:$0xff]   ;;  %v1918_v40 = vld [vmem:[%s2472_s16 + $0x120] ss:$16 sps:$4 sm:$0xff]  }
  0x91   : > { %v1919_v41 = vld [vmem:[%s2472_s16 + $0x128] ss:$16 sps:$4 sm:$0xff]   ;;  %v1920_v42 = vld [vmem:[%s2472_s16 + $0x144] ss:$16 sps:$4 sm:$0xff]   ;;  %v1922_v43 = vld [vmem:[%s2472_s16 + $0x14c] ss:$16 sps:$4 sm:$0xff]  }
  0x92   : > { %791 = vmatpush1.bf16.msra.mxu0 %v1882_v16  ;;  %834 = vmatpush1.bf16.msra.mxu1 %v1883_v17  ;;  %v1924_v44 = vld [vmem:[%s2472_s16 + $0x140] ss:$16 sps:$4 sm:$0xff]   ;;  %v1925_v45 = vld [vmem:[%s2472_s16 + $0x148] ss:$16 sps:$4 sm:$0xff]   ;;  %v1926_v46 = vld [vmem:[%s2472_s16 + $0x164] ss:$16 sps:$4 sm:$0xff]  }
  0x93   : > { %792 = vmatprep.subr.bf16.mxu0 %v1884_v18  ;;  %835 = vmatprep.subr.bf16.mxu1 %v1886_v19  ;;  %v1928_v47 = vld [vmem:[%s2472_s16 + $0x16c] ss:$16 sps:$4 sm:$0xff]   ;;  %v1930_v49 = vld [vmem:[%s2472_s16 + $0x160] ss:$16 sps:$4 sm:$0xff]   ;;  %v1931_v50 = vld [vmem:[%s2472_s16 + $0x168] ss:$16 sps:$4 sm:$0xff]  }
  0x94   : > { %v1958_v48 = vld [vmem:[%s2465_s25 + $0x4] ss:$8 sps:$4 sm:$0xff]   ;;  %v1936_v53 = vld [vmem:[%s2472_s16 + $0x180] ss:$16 sps:$4 sm:$0xff]   ;;  %v1937_v54 = vld [vmem:[%s2472_s16 + $0x188] ss:$16 sps:$4 sm:$0xff]  }
  0x95   : > { %v1932_v51 = vld [vmem:[%s2472_s16 + $0x184] ss:$16 sps:$4 sm:$0xff]   ;;  %v1934_v52 = vld [vmem:[%s2472_s16 + $0x18c] ss:$16 sps:$4 sm:$0xff]   ;;  %816 = vmatprep.mubr.bf16.mxu0 %v1958_v48  ;;  %859 = vmatprep.mubr.bf16.mxu1 %v1958_v48  ;;  %v1942_v57 = vld [vmem:[%s2472_s16 + $0x1a0] ss:$16 sps:$4 sm:$0xff]  }
  0x96   : > { %793 = vmatpush1.bf16.msra.mxu0 %v1888_v20  ;;  %836 = vmatpush1.bf16.msra.mxu1 %v1889_v21  ;;  %v1938_v55 = vld [vmem:[%s2472_s16 + $0x1a4] ss:$16 sps:$4 sm:$0xff]   ;;  %v1940_v56 = vld [vmem:[%s2472_s16 + $0x1ac] ss:$16 sps:$4 sm:$0xff]   ;;  %v1943_v58 = vld [vmem:[%s2472_s16 + $0x1a8] ss:$16 sps:$4 sm:$0xff]  }
  0x97   : > { %794 = vmatprep.subr.bf16.mxu0 %v1890_v22  ;;  %837 = vmatprep.subr.bf16.mxu1 %v1892_v23  ;;  %v1944_v59 = vld [vmem:[%s2472_s16 + $0x1c4] ss:$16 sps:$4 sm:$0xff]   ;;  %v1946_v60 = vld [vmem:[%s2472_s16 + $0x1cc] ss:$16 sps:$4 sm:$0xff]   ;;  %v1948_v61 = vld [vmem:[%s2472_s16 + $0x1c0] ss:$16 sps:$4 sm:$0xff]  }
  0x98   : > { %v1949_v62 = vld [vmem:[%s2472_s16 + $0x1c8] ss:$16 sps:$4 sm:$0xff]   ;;  %v1950_v63 = vld [vmem:[%s2472_s16 + $0x1e4] ss:$16 sps:$4 sm:$0xff]   ;;  %v1952_v0 = vld [vmem:[%s2472_s16 + $0x1ec] ss:$16 sps:$4 sm:$0xff]  }
  0x99   : > { %v1954_v1 = vld [vmem:[%s2472_s16 + $0x1e0] ss:$16 sps:$4 sm:$0xff]   ;;  %v1955_v2 = vld [vmem:[%s2472_s16 + $0x1e8] ss:$16 sps:$4 sm:$0xff]   ;;  %p1692_p6 = scmp.ne.s32.totalorder %s2225_s29, 3 }
  0x9a   : > { %795 = vmatpush1.bf16.msra.mxu0 %v1894_v24  ;;  %838 = vmatpush1.bf16.msra.mxu1 %v1895_v25  ;;  %v1956_v3 = vld [vmem:[%s2465_s25] ss:$8 sps:$4 sm:$0xff]   ;;  %v1991_v48 = vld [vmem:[#allocation9 + $0x54] ss:$8 sps:$4 sm:$0xff] (!%p1692_p6)  }
  0x9b   : > { %796 = vmatprep.subr.bf16.mxu0 %v1896_v26  ;;  %839 = vmatprep.subr.bf16.mxu1 %v1898_v27  ;;  %v380_v4 = vld [vmem:[#allocation2] sm:$0xff]  ;;  %v382_v5 = vld [vmem:[#allocation2 + $0x10] sm:$0xff]  ;;  %v381_v6 = vld [vmem:[#allocation2 + $0x8] sm:$0xff] }
  0x9c   : > { %v383_v7 = vld [vmem:[#allocation2 + $0x18] sm:$0xff]  ;;  %v384_v10 = vld [vmem:[#allocation2 + $0x20] sm:$0xff]  ;;  %v386_v11 = vld [vmem:[#allocation2 + $0x30] sm:$0xff] }
  0x9d   : > { %v385_v16 = vld [vmem:[#allocation2 + $0x28] sm:$0xff]  ;;  %v387_v17 = vld [vmem:[#allocation2 + $0x38] sm:$0xff] }
  0x9e   : > { %797 = vmatpush1.bf16.msra.mxu0 %v1900_v28  ;;  %840 = vmatpush1.bf16.msra.mxu1 %v1901_v29  ;;  %v1961_v28 = vld [vmem:[#allocation9 + $0x4] ss:$8 sps:$4 sm:$0xff] (!%p1692_p6)  }
  0x9f   : > { %798 = vmatprep.subr.bf16.mxu0 %v1902_v30  ;;  %841 = vmatprep.subr.bf16.mxu1 %v1904_v31  ;;  %v1963_v29 = vld [vmem:[#allocation9 + $0x104] ss:$8 sps:$4 sm:$0xff] (!%p1692_p6)   ;;  %v1965_v30 = vld [vmem:[#allocation9] ss:$8 sps:$4 sm:$0xff] (!%p1692_p6)  }
  0xa0   : > { %v1966_v31 = vld [vmem:[#allocation9 + $0x100] ss:$8 sps:$4 sm:$0xff] (!%p1692_p6)  }
  0xa2   : > { %799 = vmatpush1.bf16.msra.mxu0 %v1906_v32  ;;  %842 = vmatpush1.bf16.msra.mxu1 %v1907_v33  ;;  %v1967_v32 = vld [vmem:[#allocation9 + $0x14] ss:$8 sps:$4 sm:$0xff] (!%p1692_p6)  }
  0xa3   : > { %800 = vmatprep.subr.bf16.mxu0 %v1908_v34  ;;  %843 = vmatprep.subr.bf16.mxu1 %v1910_v35  ;;  %v1969_v33 = vld [vmem:[#allocation9 + $0x114] ss:$8 sps:$4 sm:$0xff] (!%p1692_p6)   ;;  %v1971_v34 = vld [vmem:[#allocation9 + $0x10] ss:$8 sps:$4 sm:$0xff] (!%p1692_p6)  }
  0xa4   : > { %v1972_v35 = vld [vmem:[#allocation9 + $0x110] ss:$8 sps:$4 sm:$0xff] (!%p1692_p6)  }
  0xa6   : > { %801 = vmatpush1.bf16.msra.mxu0 %v1912_v36  ;;  %844 = vmatpush1.bf16.msra.mxu1 %v1913_v37  ;;  %v1973_v36 = vld [vmem:[#allocation9 + $0x24] ss:$8 sps:$4 sm:$0xff] (!%p1692_p6)  }
  0xa7   : > { %802 = vmatprep.subr.bf16.mxu0 %v1914_v38  ;;  %845 = vmatprep.subr.bf16.mxu1 %v1916_v39  ;;  %v1975_v37 = vld [vmem:[#allocation9 + $0x124] ss:$8 sps:$4 sm:$0xff] (!%p1692_p6)   ;;  %v1977_v38 = vld [vmem:[#allocation9 + $0x20] ss:$8 sps:$4 sm:$0xff] (!%p1692_p6)  }
  0xa8   : > { %v1978_v39 = vld [vmem:[#allocation9 + $0x120] ss:$8 sps:$4 sm:$0xff] (!%p1692_p6)  }
  0xaa   : > { %803 = vmatpush1.bf16.msra.mxu0 %v1918_v40  ;;  %846 = vmatpush1.bf16.msra.mxu1 %v1919_v41  ;;  %v1979_v40 = vld [vmem:[#allocation9 + $0x34] ss:$8 sps:$4 sm:$0xff] (!%p1692_p6)  }
  0xab   : > { %804 = vmatprep.subr.bf16.mxu0 %v1920_v42  ;;  %847 = vmatprep.subr.bf16.mxu1 %v1922_v43  ;;  %v1981_v41 = vld [vmem:[#allocation9 + $0x134] ss:$8 sps:$4 sm:$0xff] (!%p1692_p6)   ;;  %v1983_v42 = vld [vmem:[#allocation9 + $0x30] ss:$8 sps:$4 sm:$0xff] (!%p1692_p6)  }
  0xac   : > { %v1984_v43 = vld [vmem:[#allocation9 + $0x130] ss:$8 sps:$4 sm:$0xff] (!%p1692_p6)  }
  0xae   : > { %805 = vmatpush1.bf16.msra.mxu0 %v1924_v44  ;;  %848 = vmatpush1.bf16.msra.mxu1 %v1925_v45  ;;  %v1985_v44 = vld [vmem:[#allocation9 + $0x44] ss:$8 sps:$4 sm:$0xff] (!%p1692_p6)  }
  0xaf   : > { %806 = vmatprep.subr.bf16.mxu0 %v1926_v46  ;;  %849 = vmatprep.subr.bf16.mxu1 %v1928_v47  ;;  %v1987_v45 = vld [vmem:[#allocation9 + $0x144] ss:$8 sps:$4 sm:$0xff] (!%p1692_p6)   ;;  %v1989_v46 = vld [vmem:[#allocation9 + $0x40] ss:$8 sps:$4 sm:$0xff] (!%p1692_p6)  }
  0xb0   : > { %v1990_v47 = vld [vmem:[#allocation9 + $0x140] ss:$8 sps:$4 sm:$0xff] (!%p1692_p6)  }
  0xb2   : > { %807 = vmatpush1.bf16.msra.mxu0 %v1930_v49  ;;  %850 = vmatpush1.bf16.msra.mxu1 %v1931_v50  ;;  %v1993_v49 = vld [vmem:[#allocation9 + $0x154] ss:$8 sps:$4 sm:$0xff] (!%p1692_p6)   ;;  %v1995_v50 = vld [vmem:[#allocation9 + $0x50] ss:$8 sps:$4 sm:$0xff] (!%p1692_p6)  }
  0xb3   : > { %808 = vmatprep.subr.bf16.mxu0 %v1932_v51  ;;  %851 = vmatprep.subr.bf16.mxu1 %v1934_v52  ;;  %v1996_v51 = vld [vmem:[#allocation9 + $0x150] ss:$8 sps:$4 sm:$0xff] (!%p1692_p6)   ;;  %v1997_v52 = vld [vmem:[#allocation9 + $0x64] ss:$8 sps:$4 sm:$0xff] (!%p1692_p6)  }
  0xb6   : > { %809 = vmatpush1.bf16.msra.mxu0 %v1936_v53  ;;  %852 = vmatpush1.bf16.msra.mxu1 %v1937_v54  ;;  %v1999_v53 = vld [vmem:[#allocation9 + $0x164] ss:$8 sps:$4 sm:$0xff] (!%p1692_p6)   ;;  %v2001_v54 = vld [vmem:[#allocation9 + $0x60] ss:$8 sps:$4 sm:$0xff] (!%p1692_p6)  }
  0xb7   : > { %810 = vmatprep.subr.bf16.mxu0 %v1938_v55  ;;  %853 = vmatprep.subr.bf16.mxu1 %v1940_v56  ;;  %v2002_v55 = vld [vmem:[#allocation9 + $0x160] ss:$8 sps:$4 sm:$0xff] (!%p1692_p6)   ;;  %v2003_v56 = vld [vmem:[#allocation9 + $0x74] ss:$8 sps:$4 sm:$0xff] (!%p1692_p6)  }
  0xba   : > { %811 = vmatpush1.bf16.msra.mxu0 %v1942_v57  ;;  %854 = vmatpush1.bf16.msra.mxu1 %v1943_v58  ;;  %v2005_v57 = vld [vmem:[#allocation9 + $0x174] ss:$8 sps:$4 sm:$0xff] (!%p1692_p6)   ;;  %v2007_v58 = vld [vmem:[#allocation9 + $0x70] ss:$8 sps:$4 sm:$0xff] (!%p1692_p6)  }
  0xbb   : > { %812 = vmatprep.subr.bf16.mxu0 %v1944_v59  ;;  %855 = vmatprep.subr.bf16.mxu1 %v1946_v60  ;;  %v2008_v59 = vld [vmem:[#allocation9 + $0x170] ss:$8 sps:$4 sm:$0xff] (!%p1692_p6)   ;;  %v2009_v60 = vld [vmem:[#allocation9 + $0x84] ss:$8 sps:$4 sm:$0xff] (!%p1692_p6)  }
  0xbe   : > { %813 = vmatpush1.bf16.msra.mxu0 %v1948_v61  ;;  %856 = vmatpush1.bf16.msra.mxu1 %v1949_v62  ;;  %v2011_v61 = vld [vmem:[#allocation9 + $0x184] ss:$8 sps:$4 sm:$0xff] (!%p1692_p6)   ;;  %v2013_v62 = vld [vmem:[#allocation9 + $0x80] ss:$8 sps:$4 sm:$0xff] (!%p1692_p6)  }
  0xbf   : > { %814 = vmatprep.subr.bf16.mxu0 %v1950_v63  ;;  %857 = vmatprep.subr.bf16.mxu1 %v1952_v0  ;;  %v2014_v63 = vld [vmem:[#allocation9 + $0x180] ss:$8 sps:$4 sm:$0xff] (!%p1692_p6)   ;;  %v2015_v0 = vld [vmem:[#allocation9 + $0x94] ss:$8 sps:$4 sm:$0xff] (!%p1692_p6)  }
  0xc2   : > { %815 = vmatpush1.bf16.msra.mxu0 %v1954_v1  ;;  %858 = vmatpush1.bf16.msra.mxu1 %v1955_v2  ;;  %v900_v1 = vlaneseq (!%p1692_p6)  ;;  %v2017_v2 = vld [vmem:[#allocation9 + $0x194] ss:$8 sps:$4 sm:$0xff] (!%p1692_p6)  }
  0xc3   : > { %1352 = vmatprep.subr.bf16.mxu1 (!%p1692_p6), %v1961_v28  ;;  %1395 = vmatprep.subr.bf16.mxu0 (!%p1692_p6), %v1963_v29  ;;  %v2037_v28 = vld [vmem:[#allocation9 + $0xc0] ss:$8 sps:$4 sm:$0xff] (!%p1692_p6)  }
  0xc4   : > { %v2038_v29 = vld [vmem:[#allocation9 + $0x1c0] ss:$8 sps:$4 sm:$0xff] (!%p1692_p6)  }
  0xc5   : > { %817 = vmatmul.mubr.bf16.vlgmr.msra.gmra.mrb[0].mxu0 %v1956_v3  ;;  %860 = vmatmul.mubr.bf16.vlgmr.msra.gmra.mrb[0].mxu1 %v1956_v3  ;;  %v2019_v3 = vld [vmem:[#allocation9 + $0x90] ss:$8 sps:$4 sm:$0xff] (!%p1692_p6)  }
  0xc6   : > { %1353 = vmatpush1.bf16.msra.mxu1 (!%p1692_p6), %v1965_v30  ;;  %1396 = vmatpush1.bf16.msra.mxu0 (!%p1692_p6), %v1966_v31 }
  0xc7   : > { %1354 = vmatprep.subr.bf16.mxu1 (!%p1692_p6), %v1967_v32  ;;  %1397 = vmatprep.subr.bf16.mxu0 (!%p1692_p6), %v1969_v33 }
  0xca   : > { %1355 = vmatpush1.bf16.msra.mxu1 (!%p1692_p6), %v1971_v34  ;;  %1398 = vmatpush1.bf16.msra.mxu0 (!%p1692_p6), %v1972_v35  ;;  %v2039_v35 = vld [vmem:[#allocation9 + $0xd4] ss:$8 sps:$4 sm:$0xff] (!%p1692_p6)  }
  0xcb   : > { %1356 = vmatprep.subr.bf16.mxu1 (!%p1692_p6), %v1973_v36  ;;  %1399 = vmatprep.subr.bf16.mxu0 (!%p1692_p6), %v1975_v37  ;;  %v2041_v36 = vld [vmem:[#allocation9 + $0x1d4] ss:$8 sps:$4 sm:$0xff] (!%p1692_p6)  }
  0xce   : > { %1357 = vmatpush1.bf16.msra.mxu1 (!%p1692_p6), %v1977_v38  ;;  %1400 = vmatpush1.bf16.msra.mxu0 (!%p1692_p6), %v1978_v39 }
  0xcf   : > { %1358 = vmatprep.subr.bf16.mxu1 (!%p1692_p6), %v1979_v40  ;;  %1401 = vmatprep.subr.bf16.mxu0 (!%p1692_p6), %v1981_v41 }
  0xd2   : > { %1359 = vmatpush1.bf16.msra.mxu1 (!%p1692_p6), %v1983_v42  ;;  %1402 = vmatpush1.bf16.msra.mxu0 (!%p1692_p6), %v1984_v43 }
  0xd3   : > { %1360 = vmatprep.subr.bf16.mxu1 (!%p1692_p6), %v1985_v44  ;;  %1403 = vmatprep.subr.bf16.mxu0 (!%p1692_p6), %v1987_v45 }
  0xd6   : > { %1361 = vmatpush1.bf16.msra.mxu1 (!%p1692_p6), %v1989_v46  ;;  %1404 = vmatpush1.bf16.msra.mxu0 (!%p1692_p6), %v1990_v47 }
  0xd7   : > { %1362 = vmatprep.subr.bf16.mxu1 (!%p1692_p6), %v1991_v48  ;;  %1405 = vmatprep.subr.bf16.mxu0 (!%p1692_p6), %v1993_v49 }
  0xda   : > { %1363 = vmatpush1.bf16.msra.mxu1 (!%p1692_p6), %v1995_v50  ;;  %1406 = vmatpush1.bf16.msra.mxu0 (!%p1692_p6), %v1996_v51 }
  0xdb   : > { %1364 = vmatprep.subr.bf16.mxu1 (!%p1692_p6), %v1997_v52  ;;  %1407 = vmatprep.subr.bf16.mxu0 (!%p1692_p6), %v1999_v53  ;;  %v2043_v52 = vld [vmem:[#allocation9 + $0xd0] ss:$8 sps:$4 sm:$0xff] (!%p1692_p6)  }
  0xdc   : > { %v2044_v53 = vld [vmem:[#allocation9 + $0x1d0] ss:$8 sps:$4 sm:$0xff] (!%p1692_p6)  }
  0xde   : > { %1365 = vmatpush1.bf16.msra.mxu1 (!%p1692_p6), %v2001_v54  ;;  %1408 = vmatpush1.bf16.msra.mxu0 (!%p1692_p6), %v2002_v55 }
  0xdf   : > { %1366 = vmatprep.subr.bf16.mxu1 (!%p1692_p6), %v2003_v56  ;;  %1409 = vmatprep.subr.bf16.mxu0 (!%p1692_p6), %v2005_v57  ;;  %v2045_v57 = vld [vmem:[#allocation9 + $0xe4] ss:$8 sps:$4 sm:$0xff] (!%p1692_p6)  }
  0xe2   : > { %1367 = vmatpush1.bf16.msra.mxu1 (!%p1692_p6), %v2007_v58  ;;  %1410 = vmatpush1.bf16.msra.mxu0 (!%p1692_p6), %v2008_v59  ;;  %v2047_v58 = vld [vmem:[#allocation9 + $0x1e4] ss:$8 sps:$4 sm:$0xff] (!%p1692_p6)   ;;  %v2049_v59 = vld [vmem:[#allocation9 + $0xe0] ss:$8 sps:$4 sm:$0xff] (!%p1692_p6)  }
  0xe3   : > { %1368 = vmatprep.subr.bf16.mxu1 (!%p1692_p6), %v2009_v60  ;;  %1411 = vmatprep.subr.bf16.mxu0 (!%p1692_p6), %v2011_v61  ;;  %v2050_v60 = vld [vmem:[#allocation9 + $0x1e0] ss:$8 sps:$4 sm:$0xff] (!%p1692_p6)   ;;  %v2051_v61 = vld [vmem:[#allocation9 + $0xf4] ss:$8 sps:$4 sm:$0xff] (!%p1692_p6)  }
  0xe6   : > { %1369 = vmatpush1.bf16.msra.mxu1 (!%p1692_p6), %v2013_v62  ;;  %1412 = vmatpush1.bf16.msra.mxu0 (!%p1692_p6), %v2014_v63 }
  0xe7   : > { %1370 = vmatprep.subr.bf16.mxu1 (!%p1692_p6), %v2015_v0  ;;  %1413 = vmatprep.subr.bf16.mxu0 (!%p1692_p6), %v2017_v2  ;;  %v2053_v2 = vld [vmem:[#allocation9 + $0x1f4] ss:$8 sps:$4 sm:$0xff] (!%p1692_p6)  }
  0xea   : > { %1371 = vmatpush1.bf16.msra.mxu1 (!%p1692_p6), %v2019_v3 }
 0x198   : > { %v818_v8 = vpop.f32.mrb[0].mxu0  ;;  %v861_v9 = vpop.f32.mrb[0].mxu1  ;;  %889 = sbr.rel (%p1692_p6) target bundleno = 936 (0x3a8), region = 68 }
 0x199   : > { %v870_v12 = vadd.f32 %v818_v8, %v380_v4  ;;  %v872_v13 = vadd.f32 %v861_v9, %v382_v5  ;;  %v820_v14 = vpop.f32.mrb[1].mxu0  ;;  %v863_v15 = vpop.f32.mrb[1].mxu1  ;;  %v2020_v4 = vld [vmem:[#allocation9 + $0x190] ss:$8 sps:$4 sm:$0xff] (!%p1692_p6)   ;;  %v2021_v5 = vld [vmem:[#allocation9 + $0xa4] ss:$8 sps:$4 sm:$0xff] (!%p1692_p6)  }
 0x19a   : > { %v871_v18 = vadd.f32 %v820_v14, %v381_v6  ;;  %v873_v19 = vadd.f32 %v863_v15, %v383_v7  ;;  %v822_v20 = vpop.f32.mrb[2].mxu0  ;;  %v865_v21 = vpop.f32.mrb[2].mxu1  ;;  %v2550_v6 = vshrl.u32 (!%p1692_p6), %v900_v1, 7  ;;  %v2023_v7 = vld [vmem:[#allocation9 + $0x1a4] ss:$8 sps:$4 sm:$0xff] (!%p1692_p6)   ;;  %1414 = vmatpush1.bf16.msra.mxu0 (!%p1692_p6), %v2020_v4  ;;  %1372 = vmatprep.subr.bf16.mxu1 (!%p1692_p6), %v2021_v5 }
 0x19b   : > { %878 = vst [vmem:[#allocation2] sm:$0xff] %v870_v12  ;;  %880 = vst [vmem:[#allocation2 + $0x10] sm:$0xff] %v872_v13  ;;  %v874_v22 = vadd.f32 %v822_v20, %v384_v10  ;;  %v876_v23 = vadd.f32 %v865_v21, %v386_v11  ;;  %v824_v24 = vpop.f32.mrb[3].mxu0  ;;  %v867_v25 = vpop.f32.mrb[3].mxu1  ;;  %v2025_v8 = vld [vmem:[#allocation9 + $0xa0] ss:$8 sps:$4 sm:$0xff] (!%p1692_p6)   ;;  %1415 = vmatprep.subr.bf16.mxu0 (!%p1692_p6), %v2023_v7 }
 0x19c   : > { %879 = vst [vmem:[#allocation2 + $0x8] sm:$0xff] %v871_v18  ;;  %881 = vst [vmem:[#allocation2 + $0x18] sm:$0xff] %v873_v19  ;;  %v875_v26 = vadd.f32 %v824_v24, %v385_v16  ;;  %v877_v27 = vadd.f32 %v867_v25, %v387_v17  ;;  %v2026_v9 = vld [vmem:[#allocation9 + $0x1a0] ss:$8 sps:$4 sm:$0xff] (!%p1692_p6)   ;;  %v2027_v10 = vld [vmem:[#allocation9 + $0xb4] ss:$8 sps:$4 sm:$0xff] (!%p1692_p6)   ;;  %1373 = vmatpush1.bf16.msra.mxu1 (!%p1692_p6), %v2025_v8 }
 0x19d   : > { %882 = vst [vmem:[#allocation2 + $0x20] sm:$0xff] %v874_v22  ;;  %884 = vst [vmem:[#allocation2 + $0x30] sm:$0xff] %v876_v23  ;;  %v906_v11 = vsub.s32 (!%p1692_p6), 1, %v2550_v6  ;;  %v914_v12 = vsub.s32 (!%p1692_p6), 3, %v2550_v6  ;;  %v2029_v13 = vld [vmem:[#allocation9 + $0x1b4] ss:$8 sps:$4 sm:$0xff] (!%p1692_p6)   ;;  %1374 = vmatprep.subr.bf16.mxu1 (!%p1692_p6), %v2027_v10 }
 0x19e   : > { %883 = vst [vmem:[#allocation2 + $0x28] sm:$0xff] %v875_v26  ;;  %885 = vst [vmem:[#allocation2 + $0x38] sm:$0xff] %v877_v27  ;;  %v2555_v14 = vsub.s32 (!%p1692_p6), 0, %v2550_v6  ;;  %v898_v17 = vld [vmem:[%s2623_s2] sm:$0xf] (!%p1692_p6)  ;;  %v910_v19 = vsub.s32 (!%p1692_p6), 2, %v2550_v6  ;;  %1416 = vmatpush1.bf16.msra.mxu0 (!%p1692_p6), %v2026_v9 }
 0x19f   : > { %v2031_v20 = vld [vmem:[#allocation9 + $0xb0] ss:$8 sps:$4 sm:$0xff]   ;;  %v907_v22 = vrot.slane %v898_v17, %v906_v11  ;;  %v915_v24 = vrot.slane %v898_v17, %v914_v12  ;;  %1417 = vmatprep.subr.bf16.mxu0 %v2029_v13  ;;  %v2033_v25 = vld [vmem:[#allocation9 + $0xc4] ss:$8 sps:$4 sm:$0xff]   ;;  %v1450_v13 = vld [vmem:[%s2626_s5] sm:$0x3] }
 0x1a0   : > { %v2032_v21 = vld [vmem:[#allocation9 + $0x1b0] ss:$8 sps:$4 sm:$0xff]   ;;  %v2035_v26 = vld [vmem:[#allocation9 + $0x1c4] ss:$8 sps:$4 sm:$0xff]   ;;  %v903_v27 = vrot.slane %v898_v17, %v2555_v14  ;;  %v911_v40 = vrot.slane %v898_v17, %v910_v19  ;;  %1375 = vmatpush1.bf16.msra.mxu1 %v2031_v20 }
 0x1a1   : > { %1376 = vmatprep.subr.bf16.mxu1 %v2033_v25  ;;  %v2055_v4 = vld [vmem:[#allocation9 + $0xf0] ss:$8 sps:$4 sm:$0xff]  }
 0x1a2   : > { %v890_v34 = vld [vmem:[#allocation2] sm:$0xff]  ;;  %v892_v38 = vld [vmem:[#allocation2 + $0x10] sm:$0xff]  ;;  %1418 = vmatpush1.bf16.msra.mxu0 %v2032_v21 }
 0x1a3   : > { %v891_v15 = vld [vmem:[#allocation2 + $0x8] sm:$0xff]  ;;  %v893_v18 = vld [vmem:[#allocation2 + $0x18] sm:$0xff]  ;;  %1419 = vmatprep.subr.bf16.mxu0 %v2035_v26  ;;  %v920_v47 = vadd.f32 %v903_v27, %v890_v34  ;;  %v922_v55 = vadd.f32 %v911_v40, %v892_v38 }
 0x1a4   : > { %v921_v30 = vadd.f32 %v907_v22, %v891_v15  ;;  %v923_v32 = vadd.f32 %v915_v24, %v893_v18  ;;  %v894_v37 = vld [vmem:[#allocation2 + $0x20] sm:$0xff]  ;;  %v896_v39 = vld [vmem:[#allocation2 + $0x30] sm:$0xff]  ;;  %1377 = vmatpush1.bf16.msra.mxu1 %v2037_v28 }
 0x1a5   : > { %v895_v16 = vld [vmem:[#allocation2 + $0x28] sm:$0xff]  ;;  %v897_v23 = vld [vmem:[#allocation2 + $0x38] sm:$0xff]  ;;  %v924_v51 = vadd.f32 %v903_v27, %v894_v37  ;;  %v926_v56 = vadd.f32 %v911_v40, %v896_v39  ;;  %1378 = vmatprep.subr.bf16.mxu1 %v2039_v35  ;;  %vm928_vm4 = vcmp.gt.f32.partialorder %v920_v47, 0.0  ;;  %v936_v62 = vmul.f32 0.2, %v920_v47 }
 0x1a6   : > { %v925_v31 = vadd.f32 %v907_v22, %v895_v16  ;;  %v927_v33 = vadd.f32 %v915_v24, %v897_v23  ;;  %vm929_vm0 = vcmp.gt.f32.partialorder %v921_v30, 0.0  ;;  %v937_v41 = vmul.f32 0.2, %v921_v30  ;;  %1420 = vmatpush1.bf16.msra.mxu0 %v2038_v29  ;;  %v2056_v5 = vld [vmem:[#allocation9 + $0x1f0] ss:$8 sps:$4 sm:$0xff]  }
 0x1a7   : > { %vm931_vm2 = vcmp.gt.f32.partialorder %v923_v32, 0.0  ;;  %v939_v43 = vmul.f32 0.2, %v923_v32  ;;  %1421 = vmatprep.subr.bf16.mxu0 %v2041_v36  ;;  %v940_v63 = vmul.f32 0.2, %v924_v51  ;;  %vm932_vm5 = vcmp.gt.f32.partialorder %v924_v51, 0.0 }
 0x1a8   : > { %vm933_vm1 = vcmp.gt.f32.partialorder %v925_v31, 0.0  ;;  %v941_v42 = vmul.f32 0.2, %v925_v31  ;;  %vm935_vm3 = vcmp.gt.f32.partialorder %v927_v33, 0.0  ;;  %v943_v44 = vmul.f32 0.2, %v927_v33  ;;  %1379 = vmatpush1.bf16.msra.mxu1 %v2043_v52 }
 0x1a9   : > { %v945_v45 = vsel %vm929_vm0, %v921_v30, %v937_v41  ;;  %v947_v49 = vsel %vm931_vm2, %v923_v32, %v939_v43  ;;  %v938_v0 = vmul.f32 0.2, %v922_v55  ;;  %v942_v1 = vmul.f32 0.2, %v926_v56  ;;  %1380 = vmatprep.subr.bf16.mxu1 %v2045_v57  ;;  %v1020_v15 = vld [vmem:[%s2625_s4] sm:$0x3] }
 0x1aa   : > { %v949_v46 = vsel %vm933_vm1, %v925_v31, %v941_v42  ;;  %v951_v50 = vsel %vm935_vm3, %v927_v33, %v943_v44  ;;  %1422 = vmatpush1.bf16.msra.mxu0 %v2044_v53  ;;  %vm930_vm6 = vcmp.gt.f32.partialorder %v922_v55, 0.0  ;;  %vm934_vm7 = vcmp.gt.f32.partialorder %v926_v56, 0.0 }
 0x1ab   : > { %v953_v48 = vpack.c.bf16 %v949_v46, %v945_v45  ;;  %v955_v54 = vpack.c.bf16 %v951_v50, %v947_v49  ;;  %1423 = vmatprep.subr.bf16.mxu0 %v2047_v58  ;;  %v944_v3 = vsel %vm928_vm4, %v920_v47, %v936_v62  ;;  %v948_v7 = vsel %vm932_vm5, %v924_v51, %v940_v63  ;;  %v1757_v51 = vld [vmem:[#allocation3] ss:$0 sm:$0xff] }
 0x1ac   : > { %1381 = vmatpush1.bf16.msra.mxu1 %v2049_v59  ;;  %v946_v8 = vsel %vm930_vm6, %v922_v55, %v938_v0  ;;  %v950_v9 = vsel %vm934_vm7, %v926_v56, %v942_v1  ;;  %v952_v10 = vpack.c.bf16 %v948_v7, %v944_v3  ;;  %v1451_v16 = vunpack.c.l.bf16 %v1450_v13 }
 0x1ad   : > { %1384 = vmatprep.mubr.bf16.mxu1 %v953_v48  ;;  %1427 = vmatprep.mubr.bf16.mxu0 %v955_v54  ;;  %v954_v12 = vpack.c.bf16 %v950_v9, %v946_v8  ;;  %v1025_v17 = vrot.slane %v1020_v15, %v2555_v14  ;;  %v1029_v18 = vrot.slane %v1020_v15, %v906_v11 }
 0x1ae   : > { %1424 = vmatpush1.bf16.msra.mxu0 %v2050_v60  ;;  %1382 = vmatprep.subr.bf16.mxu1 %v2051_v61  ;;  %v1456_v22 = vrot.slane %v1451_v16, %v2555_v14  ;;  %v1460_v26 = vrot.slane %v1451_v16, %v910_v19 }
 0x1af   : > { %1425 = vmatprep.subr.bf16.mxu0 %v2053_v2 }
 0x1b0   : > { %1383 = vmatpush1.bf16.msra.mxu1 %v2055_v4  ;;  %v1466_v11 = vrot.slane %v1456_v22, %v2555_v14  ;;  %v1470_v38 = vrot.slane %v1460_v26, %v2555_v14  ;;  %v2244_v14 = vmov 0  }
 0x1b1   : > { %1959 = vset.pattern.permute.xlu1 %v2244_v14  ;;  %1960 = vset.pattern.permute.xlu0 %v2244_v14 }
 0x1b2   : > { %1426 = vmatpush1.bf16.msra.mxu0 %v2056_v5 }
 0x1b3   : > { %1385 = vmatmul.mubr.bf16.vlgmr.msra.gmra.mrb[0].mxu1 %v952_v10 }
 0x1b5   : > { %1428 = vmatmul.mubr.bf16.vlgmr.msra.gmra.mrb[0].mxu0 %v954_v12 }
 0x286   : > { %v1386_v20 = vpop.f32.mrb[0].mxu1 }
 0x287   : > { %v1387_v23 = vadd.f32 %v1386_v20, %v1025_v17  ;;  %v1388_v24 = vpop.f32.mrb[1].mxu1 }
 0x288   : > { %v1429_v21 = vpop.f32.mrb[0].mxu0  ;;  %v1389_v27 = vadd.f32 %v1388_v24, %v1029_v18  ;;  %v1390_v28 = vpop.f32.mrb[2].mxu1 }
 0x289   : > { %v1431_v25 = vpop.f32.mrb[1].mxu0  ;;  %v1430_v30 = vadd.f32 %v1429_v21, %v1387_v23  ;;  %v1391_v31 = vadd.f32 %v1390_v28, %v1025_v17  ;;  %v1392_v32 = vpop.f32.mrb[3].mxu1 }
 0x28a   : > { %v1433_v29 = vpop.f32.mrb[2].mxu0  ;;  %v1432_v34 = vadd.f32 %v1431_v25, %v1389_v27  ;;  %v1393_v35 = vadd.f32 %v1392_v32, %v1029_v18 }
 0x28b   : > { %v1435_v33 = vpop.f32.mrb[3].mxu0  ;;  %vm1438_vm8 = vcmp.gt.f32.partialorder %v1430_v30, 0.0  ;;  %v1442_v36 = vmul.f32 0.2, %v1430_v30  ;;  %v1434_v37 = vadd.f32 %v1433_v29, %v1391_v31 }
 0x28c   : > { %vm1439_vm9 = vcmp.gt.f32.partialorder %v1432_v34, 0.0  ;;  %v1443_v39 = vmul.f32 0.2, %v1432_v34  ;;  %v1436_v6 = vadd.f32 %v1435_v33, %v1393_v35 }
 0x28d   : > { %vm1440_vm10 = vcmp.gt.f32.partialorder %v1434_v37, 0.0  ;;  %v1444_v19 = vmul.f32 0.2, %v1434_v37  ;;  %v1446_v40 = vsel %vm1438_vm8, %v1430_v30, %v1442_v36 }
 0x28e   : > { %vm1441_vm11 = vcmp.gt.f32.partialorder %v1436_v6, 0.0  ;;  %v1445_v41 = vmul.f32 0.2, %v1436_v6  ;;  %v1447_v42 = vsel %vm1439_vm9, %v1432_v34, %v1443_v39  ;;  %v1471_v43 = vmul.f32 %v1466_v11, %v1446_v40 }
 0x28f   : > { %v1472_v44 = vmul.f32 %v1470_v38, %v1447_v42  ;;  %v1448_v45 = vsel %vm1440_vm10, %v1434_v37, %v1444_v19 }
 0x290   : > { %v1449_v46 = vsel %vm1441_vm11, %v1436_v6, %v1445_v41  ;;  %v1473_v47 = vmul.f32 %v1466_v11, %v1448_v45 }
 0x291   : > { %v1475_v48 = vadd.f32 %v1472_v44, %v1471_v43  ;;  %v1474_v49 = vmul.f32 %v1470_v38, %v1449_v46 }
 0x293   : > { %1476 = vadd.xlane.f32.xlu0 %v1475_v48  ;;  %v1478_v50 = vadd.f32 %v1474_v49, %v1473_v47 }
 0x297   : > { %1479 = vadd.xlane.f32.xlu0 %v1478_v50 }
 0x320   : > { %v1477_v52 = vpop.xlane.xlu0 %1476 }
 0x321   : > { %v1488_v53 = vadd.f32 %v1757_v51, %v1477_v52 }
 0x323   : > { %1492 = vperm.xlu1 %1959, %v1488_v53  }
 0x324   : > { %v1480_v54 = vpop.xlane.xlu0 %1479 }
 0x325   : > { %v1489_v55 = vadd.f32 %v1757_v51, %v1480_v54 }
 0x327   : > { %1497 = vperm.xlu1 %1959, %v1489_v55  }
 0x3a2   : > { %v1493_v56 = vpop.permute.xlu1 %1492 }
 0x3a3   : > { %1500 = vst [vmem:[#allocation10] sm:$0xff] %v1493_v56 }
 0x3a6   : > { %v1498_v57 = vpop.permute.xlu1 %1497 }
 0x3a7   : > { %1501 = vst [vmem:[#allocation10 + $0x8] sm:$0xff] %v1498_v57 }
 0x3a8 PF: > { %p1799_p8 = scmp.eq.s32.totalorder %s2320_s6, 3  ;;  %s2245_s26 = smov [#allocation10]  }
 0x3a9   : > { %s1511_s3 = sshll.u32 %s2245_s26, 4  ;;  %s1512_s3 = int_to_ptr.vmem [resolvable:$true] %s1511_s3 }
 0x3aa   : > { %s2145_s17 = scalar_lea.vmem %s1512_s3, 256  ;;  %p2152_p0 = scmp.lt.s32.totalorder %s1512_s3, %s1512_s3 }
 0x3ab   : > { %p2146_p13 = scmp.ne.s32.totalorder %s1512_s3, %s2145_s17  ;;  %p2153_p4 = scmp.lt.s32.totalorder %s2145_s17, %s2145_s17 }
 0x3ad   : > { %p2147_p1 = pnand %p2146_p13, %p1799_p8  ;;  %p2154_p7 = por %p2153_p4, %p2152_p0 }
 0x3af   : > { %p2148_p2 = pneg %p2147_p1 }
 0x3b1   : > { %p2155_p9 = pnand %p2154_p7, %p2148_p2 }
 0x3b3   : > { %2158 = shalt.err (!%p2155_p9)
}
 0x3b4   : > { %s2159_s12 = scalar_lea.hbm %s2628_s7, 256 }
 0x3b5   : > { %p2160_p12 = scmp.ne.s32.totalorder %s2628_s7, %s2159_s12  ;;  %p2165_p10 = scmp.lt.u32.totalorder %s2159_s12, %s2628_s7 }
 0x3b7   : > { %p2161_p5 = pnand %p2160_p12, %p1799_p8 }
 0x3b9   : > { %p2162_p11 = pneg %p2161_p5 }
 0x3bb   : > { %p2167_p3 = pnand %p2165_p10, %p2162_p11 }
 0x3bd   : > { %2170 = shalt.err (!%p2167_p3)
}
 0x3be   : > { %s2246_s25 = smov 128   ;;  %s2247_s18 = smov 8  }
 0x3bf   : > { %1782 = dma.vmem_to_hbm [thread:$0]  (%p1799_p8), %s1512_s3, 256, %s2628_s7, [#allocation6], %s2246_s25, %s2246_s25, %s2247_s18  }
 0x3c0   : > { %2208 = dma.done.wait (%p1799_p8), [#allocation6], 256  }
 0x3c1   : > { %2210 = vsyncadd (%p1799_p8), [#allocation6], 4294967040 }
 0x3c2 PF: > { %s26_s8 = sadd.s32 1, %s2233_s8   ;;  %s2654_s16 = sld [smem:[#allocation16_spill]] }
 0x3c3   : > { %p23_p6 = scmp.ge.s32.totalorder %s26_s8, 6   ;;  %s2655_s10 = sld [smem:[#allocation15_spill]] }
 0x3c4   : > { %s2656_s26 = smov %s2217_s27  ;;  %s2657_s27 = smov %s2221_s28 }
 0x3c5   : > { %s2659_s29 = smov %s2229_s30  ;;  %25 = sbr.rel (!%p23_p6) target bundleno = 10 (0xa), region = 111 }
 0x3c8   : > { %s2658_s28 = smov %s2654_s16 }
 0x3c9   : > { %s2660_s30 = smov %s2655_s10 }
 0x3cc   :  { %1527 = vsyncpa [#allocation5], 1 }
 0x3cd   :  { %1529 = vsyncpa [#allocation5 + $0x1], 1 }
 0x3ce   :  { %1530 = vsyncpa [#allocation8], 1 }
 0x3cf   :  { %1532 = vsyncpa [#allocation8 + $0x1], 1 }
 0x3d0   :  { %1533 = vsyncpa [#allocation6], 1 }
 0x3d1   :  { %1535 = vsyncpa [#allocation6 + $0x1], 1 }

</bundles_post_ra>
